<compile_context>
chip_gen: v6e
topology: v6e:2x2x1
jax: 0.10.0
libtpu: 0.0.40
codegen_flags: <defaults>
</compile_context>

<pallas_src>
import functools

import numpy as np
import jax
import jax.numpy as jnp
from jax.experimental import pallas as pl
from jax.experimental.pallas import tpu as pltpu

_VMEM = pl.BlockSpec(memory_space=pltpu.MemorySpace.VMEM)

MARGIN = 10.0
REPEL_WEIGHT = 0.01
CLAMP_MAX = 1.0e6


def _disc_centroids_loss_kernel(feat_ref, label_ref, cent_ref, o_ref, *, size_average):
    feat = feat_ref[...]                                     # [B, D] f32
    cent = cent_ref[...]                                     # [C, D] f32
    label = label_ref[...]                                   # [B, 1] i32
    b, d = feat.shape
    c = cent.shape[0]

    # mask[i, j] = (label_i == j)
    classes = jax.lax.broadcasted_iota(jnp.int32, (b, c), 1)
    mask = label == classes                                  # [B, C] bool

    # distmat[i, j] = ||feat_i||^2 + ||cent_j||^2 - 2 * feat_i . cent_j
    feat_sq = jnp.sum(feat * feat, axis=1, keepdims=True)    # [B, 1]
    cent_sq_row = jax.lax.dot_general(                       # [1, C] (lane layout)
        jnp.ones((1, d), jnp.float32), cent * cent,
        (((1,), (1,)), ((), ())), preferred_element_type=jnp.float32)
    cross = jax.lax.dot_general(                             # [B, C]
        feat, cent, (((1,), (1,)), ((), ())),
        preferred_element_type=jnp.float32)
    distmat = feat_sq + cent_sq_row - 2.0 * cross

    # Attract term: distmat[i, label_i] == ||feat_i - cent_{label_i}||^2.
    attract_sum = jnp.sum(jnp.where(mask, distmat, 0.0))
    denom_attract = float(b) if size_average else 1.0
    loss_attract = attract_sum * (0.5 / denom_attract)

    # Repel term: masked entries are zeroed, i.e. total - masked.
    repel_sum = jnp.sum(distmat) - attract_sum
    loss_repel = jnp.clip(MARGIN - repel_sum / float(b * c), 0.0, CLAMP_MAX)

    loss = loss_attract + REPEL_WEIGHT * loss_repel
    # Lane-dense scalar write: fill the full (8,128) slab (single unmasked vst).
    o_ref[...] = jnp.full(o_ref.shape, loss, dtype=o_ref.dtype)


def disc_centroids_loss(feat, label, centroids, *, size_average=True):
    """JAX/Pallas equivalent of DiscCentroidsLoss.forward (returns a scalar)."""
    b = feat.shape[0]
    feat2 = feat.reshape(b, -1).astype(jnp.float32)
    if feat2.shape[1] != centroids.shape[1]:
        raise ValueError(
            "Center's dim: {0} should be equal to input feature's dim: {1}".format(
                centroids.shape[1], feat2.shape[1]))
    label2 = label.astype(jnp.int32).reshape(b, 1)

    out = pl.pallas_call(
        functools.partial(_disc_centroids_loss_kernel, size_average=size_average),
        out_shape=jax.ShapeDtypeStruct((8, 128), jnp.float32),
        in_specs=[_VMEM, _VMEM, _VMEM],
        out_specs=_VMEM,
    )(feat2, label2, centroids.astype(jnp.float32))
    return out[0, 0]


# TODO(synk): only the forward pass is implemented; the custom autograd
# backward of DiscCentroidsLossFunc (scatter_add centroid gradients) is not
# translated.


if __name__ == "__main__":
    NUM_CLASSES = 16
    FEAT_DIM = 128
    BATCH = 8

    key = jax.random.PRNGKey(0)
    k_c, k_f, k_l = jax.random.split(key, 3)
    # Scale down so that both the attract and (un-clamped) repel terms are active.
    centroids = 0.1 * jax.random.normal(k_c, (NUM_CLASSES, FEAT_DIM), jnp.float32)
    feat = 0.1 * jax.random.normal(k_f, (BATCH, FEAT_DIM), jnp.float32)
    label = jax.random.randint(k_l, (BATCH,), 0, NUM_CLASSES, dtype=jnp.int32)

    loss_fn = jax.jit(functools.partial(disc_centroids_loss, size_average=True))
    loss = loss_fn(feat, label, centroids)
    jax.block_until_ready(loss)

    # float64 numpy reference following the PyTorch module exactly.
    f = np.asarray(feat, dtype=np.float64)
    c = np.asarray(centroids, dtype=np.float64)
    l = np.asarray(label)
    cent_batch = c[l]
    ref_attract = ((f - cent_batch) ** 2).sum() / 2.0 / BATCH
    distmat = (f ** 2).sum(1, keepdims=True) + (c ** 2).sum(1)[None, :] - 2.0 * f @ c.T
    m = l[:, None] == np.arange(NUM_CLASSES)[None, :]
    distmat[m] = 0.0
    ref_repel = np.clip(MARGIN - distmat.sum() / (BATCH * NUM_CLASSES), 0.0, CLAMP_MAX)
    ref = ref_attract + REPEL_WEIGHT * ref_repel

    assert loss.shape == () and loss.dtype == jnp.float32
    assert np.isfinite(float(loss))
    assert abs(float(loss) - ref) <= 2e-2 * (abs(ref) + 1.0), (float(loss), ref)
    print("KERNEL_OK")
</pallas_src>

<mosaic_0001>
module attributes {stable_mosaic.version = 11 : i64} {
  func.func @_disc_centroids_loss_kernel(%arg0: memref<8x128xf32, #tpu.memory_space<vmem>>, %arg1: memref<8x1xi32, #tpu.memory_space<vmem>>, %arg2: memref<16x128xf32, #tpu.memory_space<vmem>>, %arg3: memref<8x128xf32, #tpu.memory_space<vmem>>) attributes {dimension_semantics = [], scalar_prefetch = 0 : i64, scratch_operands = 0 : i64, tpu.core_type = #tpu.core_type<tc>} {
    %c0 = arith.constant 0 : index
    %c0_0 = arith.constant 0 : index
    %0 = vector.load %arg0[%c0, %c0_0] : memref<8x128xf32, #tpu.memory_space<vmem>>, vector<8x128xf32>
    %c0_1 = arith.constant 0 : index
    %c0_2 = arith.constant 0 : index
    %1 = vector.load %arg2[%c0_1, %c0_2] : memref<16x128xf32, #tpu.memory_space<vmem>>, vector<16x128xf32>
    %c0_3 = arith.constant 0 : index
    %c0_4 = arith.constant 0 : index
    %2 = vector.load %arg1[%c0_3, %c0_4] : memref<8x1xi32, #tpu.memory_space<vmem>>, vector<8x1xi32>
    %3 = tpu.iota {dimensions = array<i32: 1>} : vector<8x16xi32>
    %4 = vector.broadcast %2 : vector<8x1xi32> to vector<8x16xi32>
    %5 = arith.cmpi eq, %4, %3 : vector<8x16xi32>
    %6 = arith.mulf %0, %0 : vector<8x128xf32>
    %cst = arith.constant dense<0.000000e+00> : vector<8xf32>
    %7 = vector.multi_reduction <add>, %6, %cst [1] : vector<8x128xf32> to vector<8xf32>
    %8 = vector.shape_cast %7 : vector<8xf32> to vector<8x1xf32>
    %cst_5 = arith.constant 1.000000e+00 : f32
    %9 = vector.broadcast %cst_5 : f32 to vector<1x128xf32>
    %10 = arith.mulf %1, %1 : vector<16x128xf32>
    %cst_6 = arith.constant dense<0.000000e+00> : vector<1x16xf32>
    %11 = tpu.matmul %9, %10, %cst_6 {dimension_numbers = #tpu.dot_dimension_numbers<[1], [1], [0], [0], [0, 0, 1, 0], [], []>} : vector<1x128xf32>, vector<16x128xf32>, vector<1x16xf32> -> vector<1x16xf32>
    %cst_7 = arith.constant dense<0.000000e+00> : vector<8x16xf32>
    %12 = tpu.matmul %0, %1, %cst_7 {dimension_numbers = #tpu.dot_dimension_numbers<[1], [1], [0], [0], [0, 0, 1, 0], [], []>} : vector<8x128xf32>, vector<16x128xf32>, vector<8x16xf32> -> vector<8x16xf32>
    %13 = vector.broadcast %8 : vector<8x1xf32> to vector<8x16xf32>
    %14 = vector.broadcast %11 : vector<1x16xf32> to vector<8x16xf32>
    %15 = arith.addf %13, %14 : vector<8x16xf32>
    %cst_8 = arith.constant 2.000000e+00 : f32
    %16 = vector.broadcast %cst_8 : f32 to vector<8x16xf32>
    %17 = arith.mulf %16, %12 : vector<8x16xf32>
    %18 = arith.subf %15, %17 : vector<8x16xf32>
    %cst_9 = arith.constant 0.000000e+00 : f32
    %19 = vector.broadcast %cst_9 : f32 to vector<8x16xf32>
    %20 = arith.select %5, %18, %19 : vector<8x16xi1>, vector<8x16xf32>
    %21 = vector.shape_cast %20 : vector<8x16xf32> to vector<1x8x16xf32>
    %cst_10 = arith.constant dense<0.000000e+00> : vector<1xf32>
    %22 = vector.multi_reduction <add>, %21, %cst_10 [1, 2] : vector<1x8x16xf32> to vector<1xf32>
    %23 = vector.shape_cast %22 : vector<1xf32> to vector<1x1x1xf32>
    %24 = vector.extract %23[0, 0, 0] : f32 from vector<1x1x1xf32>
    %cst_11 = arith.constant 6.250000e-02 : f32
    %25 = arith.mulf %24, %cst_11 : f32
    %26 = vector.shape_cast %18 : vector<8x16xf32> to vector<1x8x16xf32>
    %cst_12 = arith.constant dense<0.000000e+00> : vector<1xf32>
    %27 = vector.multi_reduction <add>, %26, %cst_12 [1, 2] : vector<1x8x16xf32> to vector<1xf32>
    %28 = vector.shape_cast %27 : vector<1xf32> to vector<1x1x1xf32>
    %29 = vector.extract %28[0, 0, 0] : f32 from vector<1x1x1xf32>
    %30 = arith.subf %29, %24 : f32
    %cst_13 = arith.constant 1.280000e+02 : f32
    %31 = arith.divf %30, %cst_13 : f32
    %cst_14 = arith.constant 1.000000e+01 : f32
    %32 = arith.subf %cst_14, %31 : f32
    %cst_15 = arith.constant 0.000000e+00 : f32
    %cst_16 = arith.constant 1.000000e+06 : f32
    %33 = arith.maximumf %cst_15, %32 : f32
    %34 = arith.minimumf %cst_16, %33 : f32
    %cst_17 = arith.constant 0.00999999977 : f32
    %35 = arith.mulf %cst_17, %34 : f32
    %36 = arith.addf %25, %35 : f32
    %37 = vector.broadcast %36 : f32 to vector<8x128xf32>
    %c0_18 = arith.constant 0 : index
    %c0_19 = arith.constant 0 : index
    %38 = vector.load %arg3[%c0_18, %c0_19] : memref<8x128xf32, #tpu.memory_space<vmem>>, vector<8x128xf32>
    tpu.vector_store %arg3[%c0_18, %c0_19], %37 {strides = array<i32>} : memref<8x128xf32, #tpu.memory_space<vmem>>, vector<8x128xf32>,
    return
  }
}

</mosaic_0001>

<bundles_post_ra>
// kernel: disc_centroids_loss.1
= control target key start
LH: loop header
LB: loop body
LE: loop exit
PB: predicated region body
PF: predicated region fallthrough
CT: control target
= control target key end

     0   :  { %8 = vsyncpa [#allocation3], 0  ;;  %s285_s12 = smov [#allocation2]   ;;  %s326_s0 = inlined_call_operand.vmem [shape: f32[8,128], index: 0, kind: input, shape index: {}]   ;;  %s327_s1 = inlined_call_operand.vmem [shape: s32[8,1], index: 1, kind: input, shape index: {}]   ;;  %s328_s2 = inlined_call_operand.hbm [shape: f32[16,128], index: 2, kind: input, shape index: {}]   ;;  %s329_s3 = inlined_call_operand.vmem [shape: f32[8,128], index: 3, kind: output, shape index: {}]  }
   0x1   :  { %s18_s13 = sshll.u32 %s285_s12, 4  ;;  %s19_s13 = int_to_ptr.vmem [resolvable:$true] %s18_s13 }
   0x2   :  { %s271_s14 = scalar_lea.vmem %s19_s13, 256  ;;  %p276_p1 = scmp.lt.s32.totalorder %s19_s13, %s19_s13 }
   0x3   :  { %p272_p0 = scmp.ne.s32.totalorder %s19_s13, %s271_s14  ;;  %p277_p2 = scmp.lt.s32.totalorder %s271_s14, %s271_s14 }
   0x5   :  { %p278_p3 = por %p277_p2, %p276_p1 }
   0x7   :  { %p279_p4 = pnand %p278_p3, %p272_p0 }
   0x9   :  { %282 = shalt.err (!%p279_p4)
}
   0xa   :  { %s286_s15 = smov 128   ;;  %s287_s16 = smov 8  }
   0xb   :  { %24 = dma.hbm_to_vmem [thread:$0]  %s328_s2, 256, %s19_s13, [#allocation3], %s286_s15, %s286_s15, %s287_s16  }
   0xc   :  { %283 = dma.done.wait [#allocation3], 256  }
   0xd   :  { %284 = vsyncadd [#allocation3], 4294967040  ;;  %v288_v0 = vmov 0.0   ;;  %vm289_vm0 = vmmov 0   ;;  %v290_v1 = vmov 0   ;;  %v30_v2 = vld [vmem:[#allocation2 + $0x8] sm:$0xff]  ;;  %v32_v10 = vlaneseq }
   0xe   :  { %235 = vmatprep.subr.mxu0 %v288_v0  ;;  %242 = vmatprep.subr.mxu1 %v288_v0  ;;  %v29_v3 = vld [vmem:[#allocation2] sm:$0xff]  ;;  %v42_v5 = vmul.f32 %v30_v2, %v30_v2  ;;  %v291_v8 = vmov 1.0   ;;  %vm191_vm2 = vcmask 130048   ;;  %s292_s25 = smov 0.0   ;;  %s293_s28 = smov 1000000.0  }
   0xf   :  { %239 = vmatprep.mubr.msk.f32.mxu0 %vm289_vm0, %v288_v0  ;;  %246 = vmatprep.mubr.msk.f32.mxu1 %vm289_vm0, %v288_v0  ;;  %v28_v4 = vld [vmem:[%s326_s0] sm:$0xff]  ;;  %v41_v7 = vmul.f32 %v29_v3, %v29_v3  ;;  %v184_v11 = vshrl.u32 %v32_v10, 7  ;;  %v33_v17 = vand.u32 127, %v32_v10 }
  0x10   :  { %262 = vset.pattern.permute.xlu0 %v290_v1  ;;  %243 = vmatpush3.xpose.msra.mxu1 %v30_v2  ;;  %v38_v6 = vmul.f32 %v28_v4, %v28_v4  ;;  %v31_v9 = vld [vmem:[%s327_s1] sm:$0xff] }
  0x11   :  { %244 = vmatprep.subr.mxu1 %v288_v0  ;;  %236 = vmatpush3.xpose.msra.mxu0 %v42_v5  ;;  %v185_v13 = vsub.s32 0, %v184_v11 }
  0x12   :  { %39 = vadd.xlane.f32.xlu0 %v38_v6  ;;  %237 = vmatprep.subr.mxu0 %v288_v0 }
  0x14   :  { %245 = vmatpush3.xpose.msra.mxu1 %v29_v3 }
  0x15   :  { %238 = vmatpush3.xpose.msra.mxu0 %v41_v7 }
  0x17   :  { %247 = vmatmul.mubr.f32.vlgmr.msra.gmra.mxu1 %v28_v4 }
  0x18   :  { %240 = vmatmul.mubr.f32.vlgmr.msra.gmra.mxu0 %v291_v8 }
  0x28   :  { %35 = vperm.xlu0 %262, %v31_v9  }
  0x9b   :  { %v40_v12 = vpop.xlane.xlu0 %39 }
  0xa3   :  { %v36_v20 = vpop.permute.xlu0 %35 }
  0xa4   :  { %vm37_vm1 = vcmp.eq.s32.totalorder %v36_v20, %v33_v17 }
  0xd7   :  { %v179_v14 = vpop.f32.mrf.mxu1 }
  0xd8   :  { %v109_v15 = vpop.f32.mrf.mxu0  ;;  %v188_v19 = vmul.f32 2.0, %v179_v14 }
  0xd9   :  { %v248_v16 = vpop.f32.mrf.mxu1  ;;  %v186_v18 = vrot.slane %v109_v15, %v185_v13 }
  0xda   :  { %v241_v21 = vpop.f32.mrf.mxu0 }
  0xdb   :  { %v187_v22 = vadd.f32 %v186_v18, %v40_v12 }
  0xdd   :  { %v189_v23 = vsub.f32 %v187_v22, %v188_v19 }
  0xdf   :  { %v190_v24 = vsel %vm37_vm1, %v189_v23, 0.0  ;;  %v203_v26 = vsel %vm191_vm2, %v189_v23, 0.0 }
  0xe0   :  { %v192_v25 = vsel %vm191_vm2, %v190_v24, 0.0 }
  0xe1   :  { %193 = vadd.xlane.f32.xlu1 %v192_v25 }
  0xe5   :  { %204 = vadd.xlane.f32.xlu1 %v203_v26 }
 0x16a   :  { %v194_v27 = vpop.xlane.xlu1 %193 }
 0x16b   :  { %v195_v28 = vrot.slane %v194_v27, 4 }
 0x16d   :  { %v196_v29 = vadd.f32 %v195_v28, %v194_v27 }
 0x16e   :  { %v205_v30 = vpop.xlane.xlu1 %204 }
 0x16f   :  { %v197_v31 = vrot.slane %v196_v29, 2  ;;  %v206_v32 = vrot.slane %v205_v30, 4 }
 0x171   :  { %v207_v33 = vadd.f32 %v206_v32, %v205_v30  ;;  %v198_v34 = vadd.f32 %v197_v31, %v196_v29 }
 0x173   :  { %v208_v35 = vrot.slane %v207_v33, 2  ;;  %v199_v36 = vrot.slane %v198_v34, 1 }
 0x175   :  { %v209_v37 = vadd.f32 %v208_v35, %v207_v33  ;;  %v200_v38 = vadd.f32 %v199_v36, %v198_v34 }
 0x177   :  { %249 = vpush %v200_v38  ;;  %v210_v39 = vrot.slane %v209_v37, 1 }
 0x179   :  { %v211_v40 = vadd.f32 %v210_v39, %v209_v37 }
 0x17b   :  { %251 = vpush %v211_v40 }
 0x1a8   :  { %s250_s0 = spop %249 }
 0x1a9   :  { %s202_s27 = smul.f32 0.0625, %s250_s0 }
 0x1ac   :  { %s252_s1 = spop %251 }
 0x1ad   :  { %s213_s22 = ssub.f32 %s252_s1, %s250_s0 }
 0x1af   :  { %s216_s23 = smul.f32 0.0078125, %s213_s22 }
 0x1b1   :  { %s217_s24 = ssub.f32 10.0, %s216_s23 }
 0x1b3   :  { %s218_s26 = smax.f32 %s292_s25, %s217_s24 }
 0x1b4   :  { %s219_s29 = smin.f32 %s293_s28, %s218_s26 }
 0x1b5   :  { %s220_s30 = smul.f32 0.01, %s219_s29 }
 0x1b7   :  { %s221_s4 = sadd.f32 %s220_s30, %s202_s27 }
 0x1b9   :  { %v222_v41 = vstv %s221_s4 }
 0x1ba   :  { %223 = vst [vmem:[%s329_s3] sm:$0xff] %v222_v41 }
 0x1bb   :  { %228 = vsyncpa [#allocation3], 1 }

</bundles_post_ra>
